<compile_context>
chip_gen: v7x
topology: tpu7x:2x2x1
jax: 0.10.0
libtpu: 0.0.40
codegen_flags: <defaults>
</compile_context>

<pallas_src>
import numpy as np
import jax
import jax.numpy as jnp
from jax import lax
from jax.experimental import pallas as pl
from jax.experimental.pallas import tpu as pltpu

CONCAT_LAST_N = 3
_TS_VREG_CAP = 2048  # soft cap: keep (3,TS) f32 accumulators far from 64 vregs


# ----------------------------------------------------------------------------
# Pallas kernel: fused nodestart / nodeend / edgespan heads, transposed output
#   h1,h2,h3 : (TB, TS, H)          bfloat16 blocks of the last 3 hidden states
#   w_stack  : (3, 3, H)            bfloat16 (resident) w_stack[slab, head, :]
#   bias     : (3, 1)               float32  rows = [nodestart, nodeend, edgespan]
#   out      : (TB, 3, TS) block of (B, 3, S) float32 (PyTorch's transposed layout)
# ----------------------------------------------------------------------------
def _heads_kernel(h1_ref, h2_ref, h3_ref, w_ref, b_ref, o_ref):
    # Contract over H:  (3, H) x (TS, H) -> (3, TS).  Lane dim of the result
    # is TS (dense, unmasked stores).  Contracting the lane dim of both
    # operands is the q.k^T orientation used by flash attention; Mosaic feeds
    # the MXU without relaying out the big (TS, H) operand.
    dn = (((1,), (1,)), ((), ()))
    bias = b_ref[...]                        # (3, 1), broadcasts over TS
    for i in range(h1_ref.shape[0]):         # static TB, unrolled at trace time
        acc = lax.dot_general(w_ref[0], h1_ref[i], dn,
                              preferred_element_type=jnp.float32)
        acc = acc + lax.dot_general(w_ref[1], h2_ref[i], dn,
                                    preferred_element_type=jnp.float32)
        acc = acc + lax.dot_general(w_ref[2], h3_ref[i], dn,
                                    preferred_element_type=jnp.float32)
        o_ref[i] = (acc + bias).astype(o_ref.dtype)


# ----------------------------------------------------------------------------
# Generation-aware VMEM budgeting + byte-aware tile selection
# ----------------------------------------------------------------------------
def _vmem_budgets():
    """Returns (requested scoped vmem_limit_bytes, kernel buffer budget bytes)."""
    phys = 64 << 20          # conservative default = v7x per-TensorCore VMEM
    try:
        info = pltpu.get_tpu_info()
        phys = int(getattr(info, "vmem_capacity_bytes", phys))
    except Exception:
        pass
    # Scoped limit we request (v6e/v5e: ~96 MiB of 128; v7x fallback: 48 MiB).
    scoped_limit = min((phys * 3) // 4, 112 << 20)
    # Budget for pipelined kernel buffers (leave headroom for compiler scratch).
    buf_budget = phys // 3
    return scoped_limit, buf_budget


def _pick_tiles(B, S, H, buf_budget, target_step_bytes=1 << 20):
    """Pick (TB, TS): batch/sequence block sizes for the head kernel."""
    in_elem = 2  # bf16 hidden states

    def in_buf(tb, ts):   # 3 inputs x double-buffered
        return 3 * 2 * tb * ts * H * in_elem

    def out_buf(tb, ts):  # (tb, 3, ts) f32, 3 padded to 8 sublanes, double-buffered
        return 2 * tb * 8 * ts * 4

    # Largest 128-multiple sequence tile dividing S that fits the VMEM budget.
    ts_cands = [t for t in range(128 * (min(S, _TS_VREG_CAP) // 128), 0, -128)
                if S % t == 0]
    if not ts_cands:
        ts_cands = [S]            # unaligned fallback: single full-extent block
    TS = ts_cands[-1]
    for t in ts_cands:
        if in_buf(1, t) + out_buf(1, t) <= buf_budget:
            TS = t
            break

    # Fold batch into the block until >= target bytes are streamed per step,
    # while staying in budget and keeping >= 2 grid steps (v7x: 2 TensorCores).
    TB = 1
    for tb in range(2, B + 1):
        if B % tb:
            continue
        steps = (B // tb) * (S // TS)
        if B >= 2 and steps < 2:
            break
        if in_buf(tb, TS) + out_buf(tb, TS) > buf_budget:
            break
        TB = tb
        if 3 * tb * TS * H * in_elem >= target_step_bytes:
            break
    return TB, TS


def node_edge_heads(h1, h2, h3, w_stack, b_heads):
    """h1/h2/h3: (B,S,H) bf16; w_stack: (3,3,H) bf16; b_heads: (3,) f32.
    Returns logits (B, 3, S) float32 (PyTorch's transposed layout)."""
    B, S, H = h1.shape
    scoped_limit, buf_budget = _vmem_budgets()
    TB, TS = _pick_tiles(B, S, H, buf_budget)
    grid = (B // TB, S // TS)
    bias2d = b_heads.reshape(3, 1).astype(jnp.float32)

    # TODO(synk): if xprof shows exposed DMA gaps with small blocks, add
    # pipeline_mode=pl.Buffered(3) to the three h BlockSpecs and sweep 2 vs 3.
    return pl.pallas_call(
        _heads_kernel,
        out_shape=jax.ShapeDtypeStruct((B, 3, S), jnp.float32),
        grid_spec=pltpu.PrefetchScalarGridSpec(
            num_scalar_prefetch=0,
            grid=grid,
            in_specs=[
                pl.BlockSpec((TB, TS, H), lambda b, s: (b, s, 0)),
                pl.BlockSpec((TB, TS, H), lambda b, s: (b, s, 0)),
                pl.BlockSpec((TB, TS, H), lambda b, s: (b, s, 0)),
                pl.BlockSpec((CONCAT_LAST_N, 3, H), lambda b, s: (0, 0, 0)),
                pl.BlockSpec((3, 1), lambda b, s: (0, 0)),
            ],
            out_specs=pl.BlockSpec((TB, 3, TS), lambda b, s: (b, 0, s)),
        ),
        compiler_params=pltpu.CompilerParams(
            dimension_semantics=("parallel", "parallel"),
            vmem_limit_bytes=int(scoped_limit)),
    )(h1, h2, h3, w_stack, bias2d)


# ----------------------------------------------------------------------------
# Deterministic synthetic stand-in for the external BERT submodule (plain JAX).
# Returns hidden_states: list of num_layers + 1 tensors of shape (B, S, H).
# ----------------------------------------------------------------------------
def synthetic_bert(x, mask, params):
    emb = params["emb"]                                  # (V, H)
    h = emb[x]                                           # (B, S, H)
    maskf = mask[..., None].astype(jnp.float32)
    hidden_states = [h]
    for W, b in zip(params["layer_ws"], params["layer_bs"]):
        h = jnp.tanh(h @ W + b) * maskf
        hidden_states.append(h)
    return hidden_states


# ----------------------------------------------------------------------------
# Full forward pass (mirrors MultiDepthNodeEdgeDetector.forward, clip_len=True)
# ----------------------------------------------------------------------------
def forward(x, params, clip_len=True):
    # Host-side clip, mirroring PyTorch's `.item()` semantics.
    x_np = np.asarray(x)
    mask_np = (x_np != 0).astype(np.int32)
    if clip_len:
        maxlen = int(mask_np.sum(1).max())
        maxlen = min(x_np.shape[1], maxlen + 1)
    else:
        maxlen = x_np.shape[1]

    # Pad the clipped length up to the next multiple of 128 so the head kernel
    # always takes the lane-dense / 128-aligned tile path; padded positions
    # are token 0 (mask 0) and are sliced off the logits below.
    # TODO(synk): production should additionally bucket maxlen to bound the
    # number of retraces and avoid the per-batch device->host sync.
    pad_len = -(-maxlen // 128) * 128
    if pad_len <= x_np.shape[1]:
        x_np = x_np[:, :pad_len]
    else:
        x_np = np.pad(x_np, ((0, 0), (0, pad_len - x_np.shape[1])))
    mask_np = (x_np != 0).astype(np.int32)

    x_j = jnp.asarray(x_np, dtype=jnp.int32)
    mask_j = jnp.asarray(mask_np, dtype=jnp.int32)

    hidden_states = synthetic_bert(x_j, mask_j, params)
    # Last 3 hidden states consumed directly (no concat -> no extra HBM pass),
    # cast to bf16 for the bandwidth-bound head matmul (f32 MXU accumulation).
    h1, h2, h3 = [h.astype(jnp.bfloat16)
                  for h in hidden_states[-CONCAT_LAST_N:]]
    w_stack = params["w_stack"].astype(jnp.bfloat16)      # (3, 3, H)

    # TODO(synk): Dropout(p=0.5) omitted — eval-mode identity (no train RNG).
    # TODO(synk): biggest remaining win is fusing these heads into the last
    # encoder layer's epilogue (consume h from VMEM before HBM writeback).
    logits_pad = node_edge_heads(h1, h2, h3, w_stack, params["b_heads"])  # (B,3,pad_len)
    logits = logits_pad[:, :, :maxlen]
    return logits, tuple(h[:, :maxlen, :] for h in (h1, h2, h3))


# ----------------------------------------------------------------------------
# Pure-JAX reference for the Pallas hot path
# ----------------------------------------------------------------------------
def reference_heads(h1, h2, h3, w_stack, b_heads):
    hcat = jnp.concatenate([h1, h2, h3], axis=-1).astype(jnp.float32)  # (B,S,3H)
    wcat = jnp.concatenate([w_stack[0], w_stack[1], w_stack[2]],
                           axis=-1).astype(jnp.float32)                # (3, 3H)
    out = jnp.einsum("bsk,ck->bcs", hcat, wcat, precision="highest")
    return out + b_heads.reshape(1, 3, 1)


# ----------------------------------------------------------------------------
# Deterministic parameter construction
# ----------------------------------------------------------------------------
def make_params(key, vocab, hidden, n_layers):
    keys = jax.random.split(key, 3 + 2 * n_layers)
    emb = jax.random.normal(keys[0], (vocab, hidden), jnp.float32) * 0.1
    layer_ws, layer_bs = [], []
    for i in range(n_layers):
        layer_ws.append(
            jax.random.normal(keys[1 + 2 * i], (hidden, hidden), jnp.float32) * 0.1)
        layer_bs.append(
            jax.random.normal(keys[2 + 2 * i], (hidden,), jnp.float32) * 0.01)
    # Original layout: three 1-unit heads on the (3H,) concat, i.e. (3H, 3).
    w_heads = jax.random.normal(
        keys[1 + 2 * n_layers], (CONCAT_LAST_N * hidden, 3), jnp.float32) * 0.1
    b_heads = jax.random.normal(
        keys[2 + 2 * n_layers], (3,), jnp.float32) * 0.01
    # Pre-split into per-hidden-state slabs: w_stack[slab, head, h]
    # == w_heads[slab * H + h, head].
    w_stack = jnp.transpose(
        w_heads.reshape(CONCAT_LAST_N, hidden, 3), (0, 2, 1))  # (3, 3, H)
    return {
        "emb": emb,
        "layer_ws": layer_ws,
        "layer_bs": layer_bs,
        "w_stack": w_stack,
        "b_heads": b_heads,
    }


if __name__ == "__main__":
    B, S, H, V, N_LAYERS = 2, 384, 32, 50, 3
    key = jax.random.PRNGKey(0)
    pkey, xkey = jax.random.split(key)
    params = make_params(pkey, V, H, N_LAYERS)

    ids = jax.random.randint(xkey, (B, S), 1, V, dtype=jnp.int32)
    pos = np.arange(S)[None, :]

    # Case 1: maxlen = 384 (128-aligned clip path).
    # Case 2: maxlen = 201 (exercises the pad-to-256 + slice-back path).
    for lengths in (np.array([383, 150]), np.array([200, 150])):
        x = jnp.where(jnp.asarray(pos < lengths[:, None]), ids, 0)
        logits, (h1, h2, h3) = forward(x, params, clip_len=True)
        logits = jax.block_until_ready(logits)

        # Correctness check of the Pallas hot path against a pure-JAX reference
        # (same bf16-quantized inputs, f32 accumulation).
        ref = reference_heads(h1, h2, h3,
                              params["w_stack"].astype(jnp.bfloat16),
                              params["b_heads"])
        np.testing.assert_allclose(np.asarray(logits), np.asarray(ref),
                                   rtol=1e-3, atol=1e-3)

        expected_maxlen = min(S, int(lengths.max()) + 1)
        assert logits.shape == (B, 3, expected_maxlen), logits.shape

    print("KERNEL_OK")
</pallas_src>

<mosaic_0001>
module attributes {stable_mosaic.version = 11 : i64} {
  func.func @_heads_kernel(%arg0: i32, %arg1: i32, %arg2: memref<1x384x32xbf16, #tpu.memory_space<vmem>>, %arg3: memref<1x384x32xbf16, #tpu.memory_space<vmem>>, %arg4: memref<1x384x32xbf16, #tpu.memory_space<vmem>>, %arg5: memref<3x3x32xbf16, #tpu.memory_space<vmem>>, %arg6: memref<3x1xf32, #tpu.memory_space<vmem>>, %arg7: memref<1x3x384xf32, #tpu.memory_space<vmem>>) attributes {dimension_semantics = [#tpu.dimension_semantics<parallel>, #tpu.dimension_semantics<parallel>], iteration_bounds = array<i64: 2, 1>, scalar_prefetch = 0 : i64, scratch_operands = 0 : i64, tpu.core_type = #tpu.core_type<tc>, window_params = [{transform_indices = @transform_0, window_bounds = array<i64: 1, 384, 32>}, {transform_indices = @transform_1, window_bounds = array<i64: 1, 384, 32>}, {transform_indices = @transform_2, window_bounds = array<i64: 1, 384, 32>}, {pipeline_mode = #tpu.pipeline_mode<synchronous>, transform_indices = @transform_3, window_bounds = array<i64: 3, 3, 32>}, {pipeline_mode = #tpu.pipeline_mode<synchronous>, transform_indices = @transform_4, window_bounds = array<i64: 3, 1>}, {transform_indices = @transform_5, window_bounds = array<i64: 1, 3, 384>}]} {
    %c0 = arith.constant 0 : index
    %c0_0 = arith.constant 0 : index
    %0 = vector.load %arg6[%c0, %c0_0] : memref<3x1xf32, #tpu.memory_space<vmem>>, vector<3x1xf32>
    %c0_1 = arith.constant 0 : index
    %c0_2 = arith.constant 0 : index
    %c0_3 = arith.constant 0 : index
    %1 = vector.load %arg5[%c0_1, %c0_2, %c0_3] : memref<3x3x32xbf16, #tpu.memory_space<vmem>>, vector<1x3x32xbf16>
    %2 = vector.shape_cast %1 : vector<1x3x32xbf16> to vector<3x32xbf16>
    %c0_4 = arith.constant 0 : index
    %c0_5 = arith.constant 0 : index
    %c0_6 = arith.constant 0 : index
    %3 = vector.load %arg2[%c0_4, %c0_5, %c0_6] : memref<1x384x32xbf16, #tpu.memory_space<vmem>>, vector<1x384x32xbf16>
    %4 = vector.shape_cast %3 : vector<1x384x32xbf16> to vector<384x32xbf16>
    %cst = arith.constant dense<0.000000e+00> : vector<3x384xf32>
    %5 = tpu.matmul %2, %4, %cst {dimension_numbers = #tpu.dot_dimension_numbers<[1], [1], [0], [0], [0, 0, 1, 0], [], []>} : vector<3x32xbf16>, vector<384x32xbf16>, vector<3x384xf32> -> vector<3x384xf32>
    %c1 = arith.constant 1 : index
    %c0_7 = arith.constant 0 : index
    %c0_8 = arith.constant 0 : index
    %6 = vector.load %arg5[%c1, %c0_7, %c0_8] : memref<3x3x32xbf16, #tpu.memory_space<vmem>>, vector<1x3x32xbf16>
    %7 = vector.shape_cast %6 : vector<1x3x32xbf16> to vector<3x32xbf16>
    %c0_9 = arith.constant 0 : index
    %c0_10 = arith.constant 0 : index
    %c0_11 = arith.constant 0 : index
    %8 = vector.load %arg3[%c0_9, %c0_10, %c0_11] : memref<1x384x32xbf16, #tpu.memory_space<vmem>>, vector<1x384x32xbf16>
    %9 = vector.shape_cast %8 : vector<1x384x32xbf16> to vector<384x32xbf16>
    %cst_12 = arith.constant dense<0.000000e+00> : vector<3x384xf32>
    %10 = tpu.matmul %7, %9, %cst_12 {dimension_numbers = #tpu.dot_dimension_numbers<[1], [1], [0], [0], [0, 0, 1, 0], [], []>} : vector<3x32xbf16>, vector<384x32xbf16>, vector<3x384xf32> -> vector<3x384xf32>
    %11 = arith.addf %5, %10 : vector<3x384xf32>
    %c2 = arith.constant 2 : index
    %c0_13 = arith.constant 0 : index
    %c0_14 = arith.constant 0 : index
    %12 = vector.load %arg5[%c2, %c0_13, %c0_14] : memref<3x3x32xbf16, #tpu.memory_space<vmem>>, vector<1x3x32xbf16>
    %13 = vector.shape_cast %12 : vector<1x3x32xbf16> to vector<3x32xbf16>
    %c0_15 = arith.constant 0 : index
    %c0_16 = arith.constant 0 : index
    %c0_17 = arith.constant 0 : index
    %14 = vector.load %arg4[%c0_15, %c0_16, %c0_17] : memref<1x384x32xbf16, #tpu.memory_space<vmem>>, vector<1x384x32xbf16>
    %15 = vector.shape_cast %14 : vector<1x384x32xbf16> to vector<384x32xbf16>
    %cst_18 = arith.constant dense<0.000000e+00> : vector<3x384xf32>
    %16 = tpu.matmul %13, %15, %cst_18 {dimension_numbers = #tpu.dot_dimension_numbers<[1], [1], [0], [0], [0, 0, 1, 0], [], []>} : vector<3x32xbf16>, vector<384x32xbf16>, vector<3x384xf32> -> vector<3x384xf32>
    %17 = arith.addf %11, %16 : vector<3x384xf32>
    %18 = vector.broadcast %0 : vector<3x1xf32> to vector<3x384xf32>
    %19 = arith.addf %17, %18 : vector<3x384xf32>
    %c0_19 = arith.constant 0 : index
    %c0_20 = arith.constant 0 : index
    %c0_21 = arith.constant 0 : index
    %20 = vector.load %arg7[%c0_19, %c0_20, %c0_21] : memref<1x3x384xf32, #tpu.memory_space<vmem>>, vector<1x3x384xf32>
    %21 = vector.shape_cast %20 : vector<1x3x384xf32> to vector<3x384xf32>
    %22 = vector.shape_cast %19 : vector<3x384xf32> to vector<1x3x384xf32>
    tpu.vector_store %arg7[%c0_19, %c0_20, %c0_21], %22 {strides = array<i32>} : memref<1x3x384xf32, #tpu.memory_space<vmem>>, vector<1x3x384xf32>,
    return
  }
  func.func @transform_0(%arg0: i32, %arg1: i32) -> (i32, i32, i32) {
    %c0_i32 = arith.constant 0 : i32
    %c0_i32_0 = arith.constant 0 : i32
    return %arg0, %arg1, %c0_i32 : i32, i32, i32
  }
  func.func @transform_1(%arg0: i32, %arg1: i32) -> (i32, i32, i32) {
    %c0_i32 = arith.constant 0 : i32
    %c0_i32_0 = arith.constant 0 : i32
    return %arg0, %arg1, %c0_i32 : i32, i32, i32
  }
  func.func @transform_2(%arg0: i32, %arg1: i32) -> (i32, i32, i32) {
    %c0_i32 = arith.constant 0 : i32
    %c0_i32_0 = arith.constant 0 : i32
    return %arg0, %arg1, %c0_i32 : i32, i32, i32
  }
  func.func @transform_3(%arg0: i32, %arg1: i32) -> (i32, i32, i32) {
    %c0_i32 = arith.constant 0 : i32
    %c0_i32_0 = arith.constant 0 : i32
    %c0_i32_1 = arith.constant 0 : i32
    %c0_i32_2 = arith.constant 0 : i32
    return %c0_i32, %c0_i32_0, %c0_i32_1 : i32, i32, i32
  }
  func.func @transform_4(%arg0: i32, %arg1: i32) -> (i32, i32) {
    %c0_i32 = arith.constant 0 : i32
    %c0_i32_0 = arith.constant 0 : i32
    %c0_i32_1 = arith.constant 0 : i32
    return %c0_i32, %c0_i32_0 : i32, i32
  }
  func.func @transform_5(%arg0: i32, %arg1: i32) -> (i32, i32, i32) {
    %c0_i32 = arith.constant 0 : i32
    %c0_i32_0 = arith.constant 0 : i32
    return %arg0, %c0_i32, %arg1 : i32, i32, i32
  }
}

</mosaic_0001>

<bundles_post_ra>
// kernel: tpu_custom_call.1
= control target key start
LH: loop header
LB: loop body
LE: loop exit
PB: predicated region body
PF: predicated region fallthrough
CT: control target
= control target key end

     0   :  { %s1871_s18 = smov 0   ;;  %s1873_s19 = smov 0   ;;  %s2135_s0 = inlined_call_operand.vmem [shape: bf16[2,384,32], index: 0, kind: input, shape index: {}]   ;;  %s2136_s1 = inlined_call_operand.vmem [shape: bf16[2,384,32], index: 1, kind: input, shape index: {}]   ;;  %s2137_s2 = inlined_call_operand.vmem [shape: bf16[2,384,32], index: 2, kind: input, shape index: {}]   ;;  %s2138_s3 = inlined_call_operand.vmem [shape: bf16[3,3,32], index: 3, kind: input, shape index: {}]   ;;  %s2139_s4 = inlined_call_operand.vmem [shape: f32[3,1], index: 4, kind: input, shape index: {}]   ;;  %s2140_s5 = inlined_call_operand.vmem [shape: f32[2,3,384], index: 5, kind: output, shape index: {}]  }
   0x1   :  { %s1875_s20 = smov 0  }
   0x2 LB: > { %s27_s21 = sadd.s32 1, %s1832_s19  ;;  %p1460_p0 = scmp.ge.s32.totalorder %s1836_s20, 1  ;;  %s1836_s20 = sphi %s1875_s20, %s15_s20   ;;  %s1832_s19 = sphi %s1873_s19, %s2142_s19   ;;  %s1828_s18 = sphi %s1871_s18, %s2141_s18  }
   0x3   : > { %p29_p1 = scmp.ge.s32.totalorder %s27_s21, 2  ;;  %p242_p2 = scmp.lt.s32.totalorder %s1836_s20, 3 }
   0x5   : > { %s2144_s21 = smov (%p29_p1, %s27_s21), 0  ;;  %p243_p3 = pnand %p1460_p0, %p242_p2 }
   0x6   : > { %p297_p4 = scmp.lt.s32.totalorder (!%p243_p3), %s1828_s18, 1  ;;  %vm557_vm0 = vcmask (!%p243_p3), 261120   ;;  %v1892_v0 = vld [vmem:[%s2138_s3 + $0x2] sm:$0x3] (!%p243_p3)  ;;  %v1838_v1 = vmov (!%p243_p3), 0.0   ;;  %vm1839_vm1 = vmmov (!%p243_p3), 0  }
   0x7   : > { %246 = sbr.rel (%p243_p3) target bundleno = 432 (0x1b0), region = 40  ;;  %1628 = vmatprep.subr.bf16.mxu1 (!%p243_p3), %v1838_v1  ;;  %1563 = vmatprep.mubr.msk.bf16.mxu0 (!%p243_p3), %vm557_vm0, %v1892_v0  ;;  %v1990_v48 = vld [vmem:[%s2138_s3] sm:$0x3] (!%p243_p3) }
   0x8   : > { %1644 = vmatprep.mubr.msk.bf16.mxu1 (!%p243_p3), %vm1839_vm1, %v1838_v1 }
   0xe   : > { %s2146_s18 = smov (!%p297_p4, %s1828_s18), 1 }
   0xf   : > { %s1902_s24 = smul.u32 192, %s2146_s18 }
  0x10   : > { %s1713_s15 = smul.u32 12, %s2146_s18 }
  0x11   : > { %s1908_s27 = scalar_lea.vmem %s2136_s1, %s1902_s24  ;;  %s1939_s30 = scalar_lea.vmem %s2135_s0, %s1902_s24 }
  0x12   : > { %v1742_v2 = vld [vmem:[%s1908_s27 + $0x40] sm:$0xff]   ;;  %v1745_v6 = vld [vmem:[%s1908_s27 + $0x48] sm:$0xff]   ;;  %v1748_v11 = vld [vmem:[%s1908_s27 + $0x50] sm:$0xff]   ;;  %s1966_s8 = scalar_lea.vmem %s2137_s2, %s1902_s24  ;;  %s334_s22 = scalar_lea.vmem %s2140_s5, %s1713_s15 }
  0x13   : > { %v1743_v3 = vld [vmem:[%s1908_s27] sm:$0xff]   ;;  %1688 = vmatprep.subr.msk.bf16.mxu0 %vm557_vm0, %v1742_v2  ;;  %v1746_v8 = vld [vmem:[%s1908_s27 + $0x8] sm:$0xff]   ;;  %v1749_v13 = vld [vmem:[%s1908_s27 + $0x10] sm:$0xff]  }
  0x14   : > { %v1744_v4 = vld [vmem:[%s1908_s27 + $0x80] sm:$0xff]   ;;  %v562_v5 = vsel %vm557_vm0, %v1743_v3, 0  ;;  %v1747_v9 = vld [vmem:[%s1908_s27 + $0x88] sm:$0xff]   ;;  %v565_v10 = vsel %vm557_vm0, %v1746_v8, 0  ;;  %v1750_v14 = vld [vmem:[%s1908_s27 + $0x90] sm:$0xff]   ;;  %v568_v15 = vsel %vm557_vm0, %v1749_v13, 0 }
  0x15   : > { %1548 = vmatpush3.bf16.xpose.msra.mxu0 %v562_v5  ;;  %v610_v7 = vsel %vm557_vm0, %v1744_v4, 0  ;;  %v613_v12 = vsel %vm557_vm0, %v1747_v9, 0  ;;  %v1751_v16 = vld [vmem:[%s1908_s27 + $0x58] sm:$0xff]   ;;  %v616_v17 = vsel %vm557_vm0, %v1750_v14, 0  ;;  %v1754_v21 = vld [vmem:[%s1908_s27 + $0x60] sm:$0xff]   ;;  %v1757_v26 = vld [vmem:[%s1908_s27 + $0x68] sm:$0xff]  }
  0x16   : > { %1629 = vmatpush3.bf16.xpose.msra.mxu1 %v610_v7  ;;  %1689 = vmatprep.subr.msk.bf16.mxu0 %vm557_vm0, %v1745_v6  ;;  %v1752_v18 = vld [vmem:[%s1908_s27 + $0x18] sm:$0xff]   ;;  %v1755_v23 = vld [vmem:[%s1908_s27 + $0x20] sm:$0xff]   ;;  %v1758_v28 = vld [vmem:[%s1908_s27 + $0x28] sm:$0xff]  }
  0x17   : > { %1630 = vmatprep.subr.bf16.mxu1 %v1838_v1  ;;  %v1753_v19 = vld [vmem:[%s1908_s27 + $0x98] sm:$0xff]   ;;  %v571_v20 = vsel %vm557_vm0, %v1752_v18, 0  ;;  %v1756_v24 = vld [vmem:[%s1908_s27 + $0xa0] sm:$0xff]   ;;  %v574_v25 = vsel %vm557_vm0, %v1755_v23, 0  ;;  %v1759_v29 = vld [vmem:[%s1908_s27 + $0xa8] sm:$0xff]   ;;  %v577_v30 = vsel %vm557_vm0, %v1758_v28, 0 }
  0x18   : > { %v619_v22 = vsel %vm557_vm0, %v1753_v19, 0  ;;  %v622_v27 = vsel %vm557_vm0, %v1756_v24, 0  ;;  %v1760_v31 = vld [vmem:[%s1908_s27 + $0x70] sm:$0xff]   ;;  %v625_v32 = vsel %vm557_vm0, %v1759_v29, 0  ;;  %v1763_v36 = vld [vmem:[%s1908_s27 + $0x78] sm:$0xff]   ;;  %v1766_v41 = vld [vmem:[%s1939_s30 + $0x40] sm:$0xff]  }
  0x19   : > { %v1761_v33 = vld [vmem:[%s1908_s27 + $0x30] sm:$0xff]   ;;  %v1764_v38 = vld [vmem:[%s1908_s27 + $0x38] sm:$0xff]   ;;  %v1767_v43 = vld [vmem:[%s1939_s30] sm:$0xff]  }
  0x1a   : > { %v1762_v34 = vld [vmem:[%s1908_s27 + $0xb0] sm:$0xff]   ;;  %v580_v35 = vsel %vm557_vm0, %v1761_v33, 0  ;;  %v1765_v39 = vld [vmem:[%s1908_s27 + $0xb8] sm:$0xff]   ;;  %v583_v40 = vsel %vm557_vm0, %v1764_v38, 0  ;;  %v1768_v44 = vld [vmem:[%s1939_s30 + $0x80] sm:$0xff]   ;;  %v838_v45 = vsel %vm557_vm0, %v1767_v43, 0 }
  0x1b   : > { %v628_v37 = vsel %vm557_vm0, %v1762_v34, 0  ;;  %v631_v42 = vsel %vm557_vm0, %v1765_v39, 0  ;;  %v1769_v46 = vld [vmem:[%s1939_s30 + $0x48] sm:$0xff]   ;;  %v886_v47 = vsel %vm557_vm0, %v1768_v44, 0  ;;  %v1772_v52 = vld [vmem:[%s1939_s30 + $0x50] sm:$0xff]   ;;  %v1775_v57 = vld [vmem:[%s1939_s30 + $0x58] sm:$0xff]  }
  0x1c   : > { %v1770_v49 = vld [vmem:[%s1939_s30 + $0x8] sm:$0xff]   ;;  %v1773_v54 = vld [vmem:[%s1939_s30 + $0x10] sm:$0xff]   ;;  %v1776_v59 = vld [vmem:[%s1939_s30 + $0x18] sm:$0xff]   ;;  %v1840_v39 = vmov 0  }
  0x1d   : > { %1550 = vmatpush3.bf16.xpose.msra.mxu0 %v565_v10  ;;  %v1771_v50 = vld [vmem:[%s1939_s30 + $0x88] sm:$0xff]   ;;  %v841_v51 = vsel %vm557_vm0, %v1770_v49, 0  ;;  %v1774_v55 = vld [vmem:[%s1939_s30 + $0x90] sm:$0xff]   ;;  %v844_v56 = vsel %vm557_vm0, %v1773_v54, 0  ;;  %v1777_v60 = vld [vmem:[%s1939_s30 + $0x98] sm:$0xff]   ;;  %v847_v61 = vsel %vm557_vm0, %v1776_v59, 0  ;;  %1741 = vset.pattern.permute.xlu0 %v1840_v39 }
  0x1e   : > { %1631 = vmatpush3.bf16.xpose.msra.mxu1 %v613_v12  ;;  %1690 = vmatprep.subr.msk.bf16.mxu0 %vm557_vm0, %v1748_v11  ;;  %v889_v53 = vsel %vm557_vm0, %v1771_v50, 0  ;;  %v892_v58 = vsel %vm557_vm0, %v1774_v55, 0  ;;  %v1778_v62 = vld [vmem:[%s1939_s30 + $0x60] sm:$0xff]   ;;  %v895_v63 = vsel %vm557_vm0, %v1777_v60, 0  ;;  %v1781_v4 = vld [vmem:[%s1939_s30 + $0x68] sm:$0xff]   ;;  %v1784_v9 = vld [vmem:[%s1939_s30 + $0x70] sm:$0xff]  }
  0x1f   : > { %1632 = vmatprep.subr.bf16.mxu1 %v1838_v1  ;;  %v1780_v2 = vld [vmem:[%s1939_s30 + $0xa0] sm:$0xff]   ;;  %v1782_v6 = vld [vmem:[%s1939_s30 + $0x28] sm:$0xff]   ;;  %v1785_v11 = vld [vmem:[%s1939_s30 + $0x30] sm:$0xff]  }
  0x20   : > { %v898_v5 = vsel %vm557_vm0, %v1780_v2, 0  ;;  %v1783_v7 = vld [vmem:[%s1939_s30 + $0xa8] sm:$0xff]   ;;  %v853_v8 = vsel %vm557_vm0, %v1782_v6, 0  ;;  %v1786_v12 = vld [vmem:[%s1939_s30 + $0xb0] sm:$0xff]   ;;  %v856_v13 = vsel %vm557_vm0, %v1785_v11, 0  ;;  %v1787_v14 = vld [vmem:[%s1939_s30 + $0x78] sm:$0xff]  }
  0x21   : > { %v901_v10 = vsel %vm557_vm0, %v1783_v7, 0  ;;  %v1790_v19 = vld [vmem:[%s1966_s8 + $0x40] sm:$0xff]   ;;  %v1793_v24 = vld [vmem:[%s1966_s8 + $0x48] sm:$0xff]   ;;  %v1798_v33 = vld [vmem:[%s1966_s8 + $0x90] sm:$0xff]  }
  0x22   : > { %v1795_v28 = vld [vmem:[%s1966_s8 + $0x88] sm:$0xff]   ;;  %v1801_v38 = vld [vmem:[%s1966_s8 + $0x98] sm:$0xff]   ;;  %v1803_v44 = vld [vmem:[%s1966_s8 + $0x20] sm:$0xff]  }
  0x23   : > { %v1221_v43 = vsel %vm557_vm0, %v1801_v38, 0  ;;  %v1806_v49 = vld [vmem:[%s1966_s8 + $0x28] sm:$0xff]   ;;  %v1809_v54 = vld [vmem:[%s1966_s8 + $0x30] sm:$0xff]   ;;  %v1812_v59 = vld [vmem:[%s1966_s8 + $0x38] sm:$0xff]  }
  0x24   : > { %v1807_v50 = vld [vmem:[%s1966_s8 + $0xa8] sm:$0xff]   ;;  %v1810_v55 = vld [vmem:[%s1966_s8 + $0xb0] sm:$0xff]   ;;  %v1813_v60 = vld [vmem:[%s1966_s8 + $0xb8] sm:$0xff]  }
  0x25   : > { %1552 = vmatpush3.bf16.xpose.msra.mxu0 %v568_v15  ;;  %v904_v15 = vsel %vm557_vm0, %v1786_v12, 0 }
  0x26   : > { %1633 = vmatpush3.bf16.xpose.msra.mxu1 %v616_v17  ;;  %1691 = vmatprep.subr.msk.bf16.mxu0 %vm557_vm0, %v1751_v16  ;;  %v1788_v16 = vld [vmem:[%s1939_s30 + $0x38] sm:$0xff]  }
  0x27   : > { %1634 = vmatprep.subr.bf16.mxu1 %v1838_v1  ;;  %v1789_v17 = vld [vmem:[%s1939_s30 + $0xb8] sm:$0xff]   ;;  %v859_v18 = vsel %vm557_vm0, %v1788_v16, 0 }
  0x2d   : > { %1554 = vmatpush3.bf16.xpose.msra.mxu0 %v571_v20  ;;  %v907_v20 = vsel %vm557_vm0, %v1789_v17, 0 }
  0x2e   : > { %1635 = vmatpush3.bf16.xpose.msra.mxu1 %v619_v22  ;;  %1692 = vmatprep.subr.msk.bf16.mxu0 %vm557_vm0, %v1754_v21  ;;  %v1791_v21 = vld [vmem:[%s1966_s8] sm:$0xff]  }
  0x2f   : > { %1636 = vmatprep.subr.bf16.mxu1 %v1838_v1  ;;  %v1792_v22 = vld [vmem:[%s1966_s8 + $0x80] sm:$0xff]   ;;  %v1164_v23 = vsel %vm557_vm0, %v1791_v21, 0 }
  0x35   : > { %1556 = vmatpush3.bf16.xpose.msra.mxu0 %v574_v25  ;;  %v1212_v25 = vsel %vm557_vm0, %v1792_v22, 0 }
  0x36   : > { %1637 = vmatpush3.bf16.xpose.msra.mxu1 %v622_v27  ;;  %1693 = vmatprep.subr.msk.bf16.mxu0 %vm557_vm0, %v1757_v26  ;;  %v2059_v26 = vld [vmem:[%s2138_s3 + $0x4] sm:$0x3]  ;;  %v1794_v27 = vld [vmem:[%s1966_s8 + $0x8] sm:$0xff]  }
  0x37   : > { %1638 = vmatprep.subr.bf16.mxu1 %v1838_v1  ;;  %v1167_v29 = vsel %vm557_vm0, %v1794_v27, 0 }
  0x3d   : > { %1558 = vmatpush3.bf16.xpose.msra.mxu0 %v577_v30  ;;  %v1796_v30 = vld [vmem:[%s1966_s8 + $0x50] sm:$0xff]  }
  0x3e   : > { %1639 = vmatpush3.bf16.xpose.msra.mxu1 %v625_v32  ;;  %1694 = vmatprep.subr.msk.bf16.mxu0 %vm557_vm0, %v1760_v31  ;;  %v1215_v31 = vsel %vm557_vm0, %v1795_v28, 0  ;;  %v1797_v32 = vld [vmem:[%s1966_s8 + $0x10] sm:$0xff]  }
  0x3f   : > { %1640 = vmatprep.subr.bf16.mxu1 %v1838_v1  ;;  %v1170_v34 = vsel %vm557_vm0, %v1797_v32, 0 }
  0x45   : > { %1560 = vmatpush3.bf16.xpose.msra.mxu0 %v580_v35  ;;  %v1799_v35 = vld [vmem:[%s1966_s8 + $0x58] sm:$0xff]  }
  0x46   : > { %1641 = vmatpush3.bf16.xpose.msra.mxu1 %v628_v37  ;;  %1695 = vmatprep.subr.msk.bf16.mxu0 %vm557_vm0, %v1763_v36  ;;  %v1218_v36 = vsel %vm557_vm0, %v1798_v33, 0  ;;  %v1800_v37 = vld [vmem:[%s1966_s8 + $0x18] sm:$0xff]  }
  0x47   : > { %1642 = vmatprep.subr.bf16.mxu1 %v1838_v1 }
  0x4d   : > { %1562 = vmatpush3.bf16.xpose.msra.mxu0 %v583_v40  ;;  %v337_v40 = vld [vmem:[%s2139_s4] sm:$0x7] }
  0x4e   : > { %1643 = vmatpush3.bf16.xpose.msra.mxu1 %v631_v42  ;;  %1696 = vmatprep.subr.msk.bf16.mxu0 %vm557_vm0, %v1766_v41  ;;  %v1173_v41 = vsel %vm557_vm0, %v1800_v37, 0  ;;  %v1802_v42 = vld [vmem:[%s1966_s8 + $0x60] sm:$0xff]  }
  0x4f   : > { %1648 = vmatprep.subr.bf16.mxu1 %v1838_v1  ;;  %1321 = vperm.xlu0 %1741, %v337_v40  }
  0x54   : > { %1564 = vmatmul.mubr.msk.bf16.vlgmr.msra.gmra.mrb[0].mxu0 %vm557_vm0, %v1892_v0 }
  0x55   : > { %1645 = vmatmul.mubr.msk.bf16.vlgmr.msra.gmra.mrb[0].mxu1 %vm557_vm0, %v1892_v0  ;;  %1575 = vmatpush3.bf16.xpose.msra.mxu0 %v838_v45  ;;  %v1779_v0 = vld [vmem:[%s1939_s30 + $0x20] sm:$0xff]  }
  0x56   : > { %1649 = vmatpush3.bf16.xpose.msra.mxu1 %v886_v47  ;;  %1697 = vmatprep.subr.msk.bf16.mxu0 %vm557_vm0, %v1769_v46  ;;  %v850_v3 = vsel %vm557_vm0, %v1779_v0, 0  ;;  %v1804_v45 = vld [vmem:[%s1966_s8 + $0xa0] sm:$0xff]   ;;  %v1176_v46 = vsel %vm557_vm0, %v1803_v44, 0  ;;  %v1805_v47 = vld [vmem:[%s1966_s8 + $0x68] sm:$0xff]  }
  0x57   : > { %1650 = vmatprep.subr.bf16.mxu1 %v1838_v1  ;;  %1590 = vmatprep.mubr.msk.bf16.mxu0 %vm557_vm0, %v1990_v48 }
  0x58   : > { %1664 = vmatprep.mubr.msk.bf16.mxu1 %vm1839_vm1, %v1838_v1 }
  0x5d   : > { %1577 = vmatpush3.bf16.xpose.msra.mxu0 %v841_v51  ;;  %v1179_v51 = vsel %vm557_vm0, %v1806_v49, 0 }
  0x5e   : > { %1651 = vmatpush3.bf16.xpose.msra.mxu1 %v889_v53  ;;  %1698 = vmatprep.subr.msk.bf16.mxu0 %vm557_vm0, %v1772_v52  ;;  %v1808_v52 = vld [vmem:[%s1966_s8 + $0x70] sm:$0xff]   ;;  %v1227_v53 = vsel %vm557_vm0, %v1807_v50, 0 }
  0x5f   : > { %1652 = vmatprep.subr.bf16.mxu1 %v1838_v1 }
  0x65   : > { %1579 = vmatpush3.bf16.xpose.msra.mxu0 %v844_v56  ;;  %v1182_v56 = vsel %vm557_vm0, %v1809_v54, 0 }
  0x66   : > { %1653 = vmatpush3.bf16.xpose.msra.mxu1 %v892_v58  ;;  %1699 = vmatprep.subr.msk.bf16.mxu0 %vm557_vm0, %v1775_v57  ;;  %v1811_v57 = vld [vmem:[%s1966_s8 + $0x78] sm:$0xff]   ;;  %v1230_v58 = vsel %vm557_vm0, %v1810_v55, 0 }
  0x67   : > { %1654 = vmatprep.subr.bf16.mxu1 %v1838_v1 }
  0x6d   : > { %1581 = vmatpush3.bf16.xpose.msra.mxu0 %v847_v61  ;;  %v1185_v61 = vsel %vm557_vm0, %v1812_v59, 0 }
  0x6e   : > { %1655 = vmatpush3.bf16.xpose.msra.mxu1 %v895_v63  ;;  %1700 = vmatprep.subr.msk.bf16.mxu0 %vm557_vm0, %v1778_v62  ;;  %v1233_v62 = vsel %vm557_vm0, %v1813_v60, 0 }
  0x6f   : > { %1656 = vmatprep.subr.bf16.mxu1 %v1838_v1 }
  0x75   : > { %1583 = vmatpush3.bf16.xpose.msra.mxu0 %v850_v3 }
  0x76   : > { %1657 = vmatpush3.bf16.xpose.msra.mxu1 %v898_v5  ;;  %1701 = vmatprep.subr.msk.bf16.mxu0 %vm557_vm0, %v1781_v4 }
  0x77   : > { %1658 = vmatprep.subr.bf16.mxu1 %v1838_v1 }
  0x7d   : > { %1585 = vmatpush3.bf16.xpose.msra.mxu0 %v853_v8 }
  0x7e   : > { %1659 = vmatpush3.bf16.xpose.msra.mxu1 %v901_v10  ;;  %1702 = vmatprep.subr.msk.bf16.mxu0 %vm557_vm0, %v1784_v9 }
  0x7f   : > { %1660 = vmatprep.subr.bf16.mxu1 %v1838_v1 }
  0x85   : > { %1587 = vmatpush3.bf16.xpose.msra.mxu0 %v856_v13 }
  0x86   : > { %1661 = vmatpush3.bf16.xpose.msra.mxu1 %v904_v15  ;;  %1703 = vmatprep.subr.msk.bf16.mxu0 %vm557_vm0, %v1787_v14 }
  0x87   : > { %1662 = vmatprep.subr.bf16.mxu1 %v1838_v1 }
  0x8d   : > { %1589 = vmatpush3.bf16.xpose.msra.mxu0 %v859_v18 }
  0x8e   : > { %1663 = vmatpush3.bf16.xpose.msra.mxu1 %v907_v20  ;;  %1704 = vmatprep.subr.msk.bf16.mxu0 %vm557_vm0, %v1790_v19 }
  0x8f   : > { %1668 = vmatprep.subr.bf16.mxu1 %v1838_v1 }
  0x94   : > { %1591 = vmatmul.mubr.msk.bf16.vlgmr.msra.gmra.mrb[4].mxu0 %vm557_vm0, %v1990_v48 }
  0x95   : > { %1665 = vmatmul.mubr.msk.bf16.vlgmr.msra.gmra.mrb[4].mxu1 %vm557_vm0, %v1990_v48  ;;  %1602 = vmatpush3.bf16.xpose.msra.mxu0 %v1164_v23  ;;  %v1224_v48 = vsel %vm557_vm0, %v1804_v45, 0 }
  0x96   : > { %1669 = vmatpush3.bf16.xpose.msra.mxu1 %v1212_v25  ;;  %1705 = vmatprep.subr.msk.bf16.mxu0 %vm557_vm0, %v1793_v24 }
  0x97   : > { %1670 = vmatprep.subr.bf16.mxu1 %v1838_v1  ;;  %1617 = vmatprep.mubr.msk.bf16.mxu0 %vm557_vm0, %v2059_v26 }
  0x98   : > { %1684 = vmatprep.mubr.msk.bf16.mxu1 %vm1839_vm1, %v1838_v1 }
  0x9d   : > { %1604 = vmatpush3.bf16.xpose.msra.mxu0 %v1167_v29 }
  0x9e   : > { %1671 = vmatpush3.bf16.xpose.msra.mxu1 %v1215_v31  ;;  %1706 = vmatprep.subr.msk.bf16.mxu0 %vm557_vm0, %v1796_v30 }
  0x9f   : > { %1672 = vmatprep.subr.bf16.mxu1 %v1838_v1 }
  0xa5   : > { %1606 = vmatpush3.bf16.xpose.msra.mxu0 %v1170_v34 }
  0xa6   : > { %1673 = vmatpush3.bf16.xpose.msra.mxu1 %v1218_v36  ;;  %1707 = vmatprep.subr.msk.bf16.mxu0 %vm557_vm0, %v1799_v35 }
  0xa7   : > { %1674 = vmatprep.subr.bf16.mxu1 %v1838_v1 }
  0xad   : > { %1608 = vmatpush3.bf16.xpose.msra.mxu0 %v1173_v41 }
  0xae   : > { %1675 = vmatpush3.bf16.xpose.msra.mxu1 %v1221_v43  ;;  %1708 = vmatprep.subr.msk.bf16.mxu0 %vm557_vm0, %v1802_v42 }
  0xaf   : > { %1676 = vmatprep.subr.bf16.mxu1 %v1838_v1 }
  0xb5   : > { %1610 = vmatpush3.bf16.xpose.msra.mxu0 %v1176_v46 }
  0xb6   : > { %1677 = vmatpush3.bf16.xpose.msra.mxu1 %v1224_v48  ;;  %1709 = vmatprep.subr.msk.bf16.mxu0 %vm557_vm0, %v1805_v47 }
  0xb7   : > { %1678 = vmatprep.subr.bf16.mxu1 %v1838_v1 }
  0xbd   : > { %1612 = vmatpush3.bf16.xpose.msra.mxu0 %v1179_v51 }
  0xbe   : > { %1679 = vmatpush3.bf16.xpose.msra.mxu1 %v1227_v53  ;;  %1710 = vmatprep.subr.msk.bf16.mxu0 %vm557_vm0, %v1808_v52 }
  0xbf   : > { %1680 = vmatprep.subr.bf16.mxu1 %v1838_v1 }
  0xc5   : > { %1614 = vmatpush3.bf16.xpose.msra.mxu0 %v1182_v56 }
  0xc6   : > { %1681 = vmatpush3.bf16.xpose.msra.mxu1 %v1230_v58  ;;  %1711 = vmatprep.subr.msk.bf16.mxu0 %vm557_vm0, %v1811_v57 }
  0xc7   : > { %1682 = vmatprep.subr.bf16.mxu1 %v1838_v1 }
  0xcd   : > { %1616 = vmatpush3.bf16.xpose.msra.mxu0 %v1185_v61 }
  0xce   : > { %1683 = vmatpush3.bf16.xpose.msra.mxu1 %v1233_v62  ;;  %v1322_v19 = vpop.permute.xlu0 %1321 }
  0xd4   : > { %1618 = vmatmul.mubr.msk.bf16.vlgmr.msra.gmra.mrb[8].mxu0 %vm557_vm0, %v2059_v26 }
  0xd5   : > { %1685 = vmatmul.mubr.msk.bf16.vlgmr.msra.gmra.mrb[8].mxu1 %vm557_vm0, %v2059_v26 }
 0x127   : > { %v667_v63 = vpop.f32.mrb[0].mxu0 }
 0x128   : > { %v669_v0 = vpop.f32.mrb[1].mxu0  ;;  %v708_v2 = vpop.f32.mrb[0].mxu1 }
 0x129   : > { %v671_v3 = vpop.f32.mrb[2].mxu0  ;;  %v1646_v4 = vpop.f32.mrb[1].mxu1 }
 0x12a   : > { %v672_v1 = vpop.f32.mrb[3].mxu0  ;;  %v711_v5 = vpop.f32.mrb[2].mxu1 }
 0x12b   : > { %v1647_v6 = vpop.f32.mrb[3].mxu1 }
 0x167   : > { %v943_v7 = vpop.f32.mrb[4].mxu0 }
 0x168   : > { %v944_v8 = vadd.f32 %v943_v7, %v667_v63  ;;  %v984_v9 = vpop.f32.mrb[4].mxu1  ;;  %v945_v10 = vpop.f32.mrb[5].mxu0 }
 0x169   : > { %v985_v11 = vadd.f32 %v984_v9, %v708_v2  ;;  %v946_v12 = vadd.f32 %v945_v10, %v669_v0  ;;  %v947_v13 = vpop.f32.mrb[6].mxu0  ;;  %v1666_v14 = vpop.f32.mrb[5].mxu1 }
 0x16a   : > { %v948_v15 = vpop.f32.mrb[7].mxu0  ;;  %v987_v16 = vpop.f32.mrb[6].mxu1 }
 0x16b   : > { %v1667_v17 = vpop.f32.mrb[7].mxu1 }
 0x1a7   : > { %v1269_v18 = vpop.f32.mrb[8].mxu0 }
 0x1a8   : > { %v1316_v20 = vadd.f32 %v1269_v18, %v944_v8  ;;  %v1310_v21 = vpop.f32.mrb[8].mxu1  ;;  %v1271_v22 = vpop.f32.mrb[9].mxu0 }
 0x1a9   : > { %v1318_v23 = vadd.f32 %v1310_v21, %v985_v11  ;;  %v1317_v24 = vadd.f32 %v1271_v22, %v946_v12  ;;  %v1686_v25 = vpop.f32.mrb[9].mxu1  ;;  %v1273_v26 = vpop.f32.mrb[10].mxu0 }
 0x1aa   : > { %v1324_v27 = vadd.f32 %v1322_v19, %v1316_v20  ;;  %v1313_v28 = vpop.f32.mrb[10].mxu1  ;;  %v1274_v29 = vpop.f32.mrb[11].mxu0 }
 0x1ab   : > { %v1325_v30 = vadd.f32 %v1322_v19, %v1317_v24  ;;  %v1326_v31 = vadd.f32 %v1322_v19, %v1318_v23  ;;  %v1687_v32 = vpop.f32.mrb[11].mxu1 }
 0x1ad   : > { %v1329_v33 = vcombine.low %v1324_v27, %v1325_v30  ;;  %1332 = vst [vmem:[%s334_s22 + $0x8] sm:$0x7] %v1326_v31 }
 0x1af   : > { %1331 = vst [vmem:[%s334_s22] sm:$0x77] %v1329_v33 }
 0x1b0 PF: > { %s15_s20 = sadd.s32 1, %s1836_s20   ;;  %s2141_s18 = smov %s1832_s19 }
 0x1b1   : > { %p12_p5 = scmp.ge.s32.totalorder %s15_s20, 4   ;;  %s2142_s19 = smov %s2144_s21 }
 0x1b3   :  { %14 = sbr.rel (!%p12_p5) target bundleno = 2 (0x2), region = 78 }

</bundles_post_ra>
